<compile_context>
chip_gen: v6e
topology: v6e:2x2x1
jax: 0.10.0
libtpu: 0.0.40
codegen_flags: <defaults>
</compile_context>

<pallas_src>
import jax
import jax.numpy as jnp
from jax.experimental import pallas as pl
from jax.experimental.pallas import tpu as pltpu


def _fuse_attn_kernel(x_ref, w1_ref, b1_ref, w2_ref, o_ref):
    Bb, T, D = x_ref.shape          # batch-chunk, seq, d_hid
    H = w2_ref.shape[1]             # d_head

    x = x_ref[...]                                   # (Bb, T, D)
    # Zero-copy: folds leading dims only, last dim unchanged.
    x2d = x.reshape(Bb * T, D)

    # fc1: one MXU matmul with Bb*T rows, f32 accumulation; bias add in f32.
    acc = jnp.dot(x2d, w1_ref[...], preferred_element_type=jnp.float32) + b1_ref[...]
    # tanh in the compute dtype (bf16 by default -> bf16 EUP on v6e/v7x, half the VMEM).
    h = jnp.tanh(acc.astype(w2_ref.dtype))           # (Bb*T, 512)

    # fc2 without bias: b2 is constant along the softmax (T) axis per head, so it
    # cancels exactly in the softmax.
    att = jnp.dot(h, w2_ref[...], preferred_element_type=jnp.float32)  # (Bb*T, H)
    att = att.reshape(Bb, T, H)                      # split leading dim only

    # Softmax over the sequence axis == PyTorch transpose(1,2) + softmax(dim=2).
    m = jnp.max(att, axis=1, keepdims=True)
    e = jnp.exp(att - m)
    s = jnp.sum(e, axis=1, keepdims=True)
    att = e * pl.reciprocal(s, approx=True)          # (Bb, T, H)

    # out[b, h*D:(h+1)*D] = sum_t att[b, t, h] * x[b, t, :].
    # d_head is tiny (4): keep this on the VPU as a weighted sum per head, then do a
    # single unmasked, lane-dense (Bb, H*D) store (3 full 128-lane vregs wide).
    xf = x.astype(jnp.float32)
    pieces = [jnp.sum(att[:, :, hh:hh + 1] * xf, axis=1) for hh in range(H)]
    o_ref[...] = jnp.concatenate(pieces, axis=1).astype(o_ref.dtype)


def _pick_block_b(B, T):
    target = max(1, 2048 // max(T, 1))   # ~2048 fused MXU rows per grid step
    quarter = pl.cdiv(B, 4)              # keep >= 4 grid steps when B allows (v7x megacore)
    bb = max(1, min(target, quarter))
    if bb >= B:
        return B                         # single block == full dim, no alignment needed
    if bb % 8:
        bb = (bb + 7) // 8 * 8           # sublane alignment for multi-block output
    return min(bb, B)


def fuse_base_self_attention(x, w1, b1, w2, b2=None, *, block_b=None,
                             compute_dtype=jnp.bfloat16):
    """x: (B, T, d_hid); w1: (d_hid, 512); b1: (512,); w2: (512, d_head).

    b2 is accepted for API parity but is an exact no-op (constant along the softmax axis).
    compute_dtype=bf16 (default) halves x/weight DMA and uses the bf16 MXU/EUP on
    v6e/v7x; accumulation stays f32.  Pass compute_dtype=jnp.float32 for a tighter path.
    """
    del b2  # cancels exactly in the softmax
    B, T, D = x.shape
    F = w1.shape[1]                  # 512
    H = w2.shape[1]                  # d_head
    out_dtype = x.dtype

    if compute_dtype is not None and compute_dtype != x.dtype:
        x_in = x.astype(compute_dtype)
        w1_in = w1.astype(compute_dtype)
        w2_in = w2.astype(compute_dtype)
    else:
        x_in, w1_in, w2_in = x, w1, w2
    b1_2d = b1.astype(jnp.float32).reshape(1, F)

    if block_b is None:
        block_b = _pick_block_b(B, T)
    else:
        block_b = max(1, min(block_b, B))
    if block_b < B and block_b % 8:
        block_b = min(B, (block_b + 7) // 8 * 8)

    Bp = pl.cdiv(B, block_b) * block_b
    if Bp != B:
        x_in = jnp.pad(x_in, ((0, Bp - B), (0, 0), (0, 0)))
    n_blocks = Bp // block_b

    in_item = x_in.dtype.itemsize
    w_item = w1_in.dtype.itemsize
    out_item = jnp.zeros((), out_dtype).dtype.itemsize
    cost = pl.CostEstimate(
        flops=2 * Bp * T * (D * F + F * H + H * D),
        transcendentals=Bp * T * (F + H) + Bp * H,
        # Weights/bias have constant index_maps -> DMA'd once, counted once.
        bytes_accessed=(Bp * T * D) * in_item
        + (D * F + F * H) * w_item + F * 4
        + Bp * H * D * out_item,
    )

    out = pl.pallas_call(
        _fuse_attn_kernel,
        out_shape=jax.ShapeDtypeStruct((Bp, H * D), out_dtype),
        grid_spec=pltpu.PrefetchScalarGridSpec(
            num_scalar_prefetch=0,
            grid=(n_blocks,),
            in_specs=[
                pl.BlockSpec((block_b, T, D), lambda i: (i, 0, 0)),
                pl.BlockSpec((D, F), lambda i: (0, 0)),
                pl.BlockSpec((1, F), lambda i: (0, 0)),
                pl.BlockSpec((F, H), lambda i: (0, 0)),
            ],
            out_specs=pl.BlockSpec((block_b, H * D), lambda i: (i, 0)),
        ),
        compiler_params=pltpu.CompilerParams(
            dimension_semantics=("parallel",),
        ),
        cost_estimate=cost,
    )(x_in, w1_in, b1_2d, w2_in)

    return out[:B] if Bp != B else out


def reference(x, w1, b1, w2, b2):
    att = jnp.tanh(x @ w1 + b1)           # (B, T, 512)
    att = att @ w2 + b2                   # (B, T, d_head)
    att = jnp.swapaxes(att, 1, 2)         # (B, d_head, T)
    att = jax.nn.softmax(att, axis=2)
    out = att @ x                         # (B, d_head, d_hid)
    return out.reshape(x.shape[0], -1)


if __name__ == "__main__":
    # Module defaults: d_hid=96, d_head=4, fc1 hidden = 512 (hardcoded).
    d_hid, d_head, d_ff, T = 96, 4, 512, 8

    key = jax.random.PRNGKey(0)
    kx, k1, k2, k3, k4 = jax.random.split(key, 5)

    # nn.Linear weights stored pre-transposed as (in, out) for x @ W.
    w1 = jax.random.normal(k1, (d_hid, d_ff), dtype=jnp.float32) * 0.05
    b1 = jax.random.normal(k2, (d_ff,), dtype=jnp.float32) * 0.05
    w2 = jax.random.normal(k3, (d_ff, d_head), dtype=jnp.float32) * 0.05
    b2 = jax.random.normal(k4, (d_head,), dtype=jnp.float32) * 0.05

    # --- small shape (B=2): single block path ---
    B = 2
    x = jax.random.normal(kx, (B, T, d_hid), dtype=jnp.float32)
    ref = reference(x, w1, b1, w2, b2)

    # f32 compute path (exact up to the approx reciprocal in the softmax denominator).
    out_f32 = jax.block_until_ready(
        fuse_base_self_attention(x, w1, b1, w2, b2, compute_dtype=jnp.float32))
    assert out_f32.shape == (B, d_head * d_hid), out_f32.shape
    assert jnp.allclose(out_f32, ref, atol=5e-3, rtol=5e-3), \
        float(jnp.max(jnp.abs(out_f32 - ref)))

    # Default bf16 path (bf16 MXU/EUP inputs, f32 accumulation).
    out_bf16 = jax.block_until_ready(fuse_base_self_attention(x, w1, b1, w2, b2))
    assert out_bf16.shape == (B, d_head * d_hid), out_bf16.shape
    assert jnp.allclose(out_bf16, ref, atol=5e-2, rtol=5e-2), \
        float(jnp.max(jnp.abs(out_bf16 - ref)))

    # --- larger batch (B=33): multi-block path with 8-aligned block_b and padding ---
    B2 = 33
    x2 = jax.random.normal(kx, (B2, T, d_hid), dtype=jnp.float32)
    ref2 = reference(x2, w1, b1, w2, b2)
    out2 = jax.block_until_ready(fuse_base_self_attention(x2, w1, b1, w2, b2))
    assert out2.shape == (B2, d_head * d_hid), out2.shape
    assert jnp.allclose(out2, ref2, atol=5e-2, rtol=5e-2), \
        float(jnp.max(jnp.abs(out2 - ref2)))

    print("KERNEL_OK")
</pallas_src>

<mosaic_0001>
module attributes {stable_mosaic.version = 11 : i64} {
  func.func @_fuse_attn_kernel(%arg0: i32, %arg1: memref<2x8x96xf32, #tpu.memory_space<vmem>>, %arg2: memref<96x512xf32, #tpu.memory_space<vmem>>, %arg3: memref<1x512xf32, #tpu.memory_space<vmem>>, %arg4: memref<512x4xf32, #tpu.memory_space<vmem>>, %arg5: memref<2x384xf32, #tpu.memory_space<vmem>>) attributes {dimension_semantics = [#tpu.dimension_semantics<parallel>], iteration_bounds = array<i64: 1>, scalar_prefetch = 0 : i64, scratch_operands = 0 : i64, tpu.core_type = #tpu.core_type<tc>, window_params = [{transform_indices = @transform_0, window_bounds = array<i64: 2, 8, 96>}, {pipeline_mode = #tpu.pipeline_mode<synchronous>, transform_indices = @transform_1, window_bounds = array<i64: 96, 512>}, {pipeline_mode = #tpu.pipeline_mode<synchronous>, transform_indices = @transform_2, window_bounds = array<i64: 1, 512>}, {pipeline_mode = #tpu.pipeline_mode<synchronous>, transform_indices = @transform_3, window_bounds = array<i64: 512, 4>}, {transform_indices = @transform_4, window_bounds = array<i64: 2, 384>}]} {
    %c0 = arith.constant 0 : index
    %c0_0 = arith.constant 0 : index
    %c0_1 = arith.constant 0 : index
    %0 = vector.load %arg1[%c0, %c0_0, %c0_1] : memref<2x8x96xf32, #tpu.memory_space<vmem>>, vector<2x8x96xf32>
    %1 = vector.shape_cast %0 : vector<2x8x96xf32> to vector<16x96xf32>
    %c0_2 = arith.constant 0 : index
    %c0_3 = arith.constant 0 : index
    %2 = vector.load %arg2[%c0_2, %c0_3] : memref<96x512xf32, #tpu.memory_space<vmem>>, vector<96x512xf32>
    %cst = arith.constant dense<0.000000e+00> : vector<16x512xf32>
    %3 = tpu.matmul %1, %2, %cst {dimension_numbers = #tpu.dot_dimension_numbers<[1], [0], [0], [1], [0, 0, 1, 1], [], []>} : vector<16x96xf32>, vector<96x512xf32>, vector<16x512xf32> -> vector<16x512xf32>
    %c0_4 = arith.constant 0 : index
    %c0_5 = arith.constant 0 : index
    %4 = vector.load %arg3[%c0_4, %c0_5] : memref<1x512xf32, #tpu.memory_space<vmem>>, vector<1x512xf32>
    %5 = vector.broadcast %4 : vector<1x512xf32> to vector<16x512xf32>
    %6 = arith.addf %3, %5 : vector<16x512xf32>
    %7 = math.tanh %6 : vector<16x512xf32>
    %c0_6 = arith.constant 0 : index
    %c0_7 = arith.constant 0 : index
    %8 = vector.load %arg4[%c0_6, %c0_7] : memref<512x4xf32, #tpu.memory_space<vmem>>, vector<512x4xf32>
    %cst_8 = arith.constant dense<0.000000e+00> : vector<16x4xf32>
    %9 = tpu.matmul %7, %8, %cst_8 {dimension_numbers = #tpu.dot_dimension_numbers<[1], [0], [0], [1], [0, 0, 1, 1], [], []>} : vector<16x512xf32>, vector<512x4xf32>, vector<16x4xf32> -> vector<16x4xf32>
    %10 = vector.shape_cast %9 : vector<16x4xf32> to vector<2x8x4xf32>
    %cst_9 = arith.constant dense<0xFF800000> : vector<2x4xf32>
    %11 = vector.multi_reduction <maximumf>, %10, %cst_9 [1] : vector<2x8x4xf32> to vector<2x4xf32>
    %12 = vector.shape_cast %11 : vector<2x4xf32> to vector<2x1x4xf32>
    %13 = vector.broadcast %12 : vector<2x1x4xf32> to vector<2x8x4xf32>
    %14 = arith.subf %10, %13 : vector<2x8x4xf32>
    %15 = math.exp %14 : vector<2x8x4xf32>
    %cst_10 = arith.constant dense<0.000000e+00> : vector<2x4xf32>
    %16 = vector.multi_reduction <add>, %15, %cst_10 [1] : vector<2x8x4xf32> to vector<2x4xf32>
    %17 = vector.shape_cast %16 : vector<2x4xf32> to vector<2x1x4xf32>
    %18 = tpu.reciprocal %17 {approx = true} : vector<2x1x4xf32> -> vector<2x1x4xf32>
    %19 = vector.broadcast %18 : vector<2x1x4xf32> to vector<2x8x4xf32>
    %20 = arith.mulf %15, %19 : vector<2x8x4xf32>
    %21 = vector.extract_strided_slice %20 {offsets = [0, 0, 0], sizes = [2, 8, 1], strides = [1, 1, 1]} : vector<2x8x4xf32> to vector<2x8x1xf32>
    %22 = vector.broadcast %21 : vector<2x8x1xf32> to vector<2x8x96xf32>
    %23 = arith.mulf %22, %0 : vector<2x8x96xf32>
    %cst_11 = arith.constant dense<0.000000e+00> : vector<2x96xf32>
    %24 = vector.multi_reduction <add>, %23, %cst_11 [1] : vector<2x8x96xf32> to vector<2x96xf32>
    %25 = vector.extract_strided_slice %20 {offsets = [0, 0, 1], sizes = [2, 8, 1], strides = [1, 1, 1]} : vector<2x8x4xf32> to vector<2x8x1xf32>
    %26 = vector.broadcast %25 : vector<2x8x1xf32> to vector<2x8x96xf32>
    %27 = arith.mulf %26, %0 : vector<2x8x96xf32>
    %cst_12 = arith.constant dense<0.000000e+00> : vector<2x96xf32>
    %28 = vector.multi_reduction <add>, %27, %cst_12 [1] : vector<2x8x96xf32> to vector<2x96xf32>
    %29 = vector.extract_strided_slice %20 {offsets = [0, 0, 2], sizes = [2, 8, 1], strides = [1, 1, 1]} : vector<2x8x4xf32> to vector<2x8x1xf32>
    %30 = vector.broadcast %29 : vector<2x8x1xf32> to vector<2x8x96xf32>
    %31 = arith.mulf %30, %0 : vector<2x8x96xf32>
    %cst_13 = arith.constant dense<0.000000e+00> : vector<2x96xf32>
    %32 = vector.multi_reduction <add>, %31, %cst_13 [1] : vector<2x8x96xf32> to vector<2x96xf32>
    %33 = vector.extract_strided_slice %20 {offsets = [0, 0, 3], sizes = [2, 8, 1], strides = [1, 1, 1]} : vector<2x8x4xf32> to vector<2x8x1xf32>
    %34 = vector.broadcast %33 : vector<2x8x1xf32> to vector<2x8x96xf32>
    %35 = arith.mulf %34, %0 : vector<2x8x96xf32>
    %cst_14 = arith.constant dense<0.000000e+00> : vector<2x96xf32>
    %36 = vector.multi_reduction <add>, %35, %cst_14 [1] : vector<2x8x96xf32> to vector<2x96xf32>
    %37 = tpu.concatenate %24, %28, %32, %36 in 1 : vector<2x96xf32>, vector<2x96xf32>, vector<2x96xf32>, vector<2x96xf32> -> vector<2x384xf32>
    %c0_15 = arith.constant 0 : index
    %c0_16 = arith.constant 0 : index
    %38 = vector.load %arg5[%c0_15, %c0_16] : memref<2x384xf32, #tpu.memory_space<vmem>>, vector<2x384xf32>
    tpu.vector_store %arg5[%c0_15, %c0_16], %37 {strides = array<i32>} : memref<2x384xf32, #tpu.memory_space<vmem>>, vector<2x384xf32>,
    return
  }
  func.func @transform_0(%arg0: i32) -> (i32, i32, i32) {
    %c0_i32 = arith.constant 0 : i32
    %c0_i32_0 = arith.constant 0 : i32
    %c0_i32_1 = arith.constant 0 : i32
    return %arg0, %c0_i32, %c0_i32_0 : i32, i32, i32
  }
  func.func @transform_1(%arg0: i32) -> (i32, i32) {
    %c0_i32 = arith.constant 0 : i32
    %c0_i32_0 = arith.constant 0 : i32
    %c0_i32_1 = arith.constant 0 : i32
    return %c0_i32, %c0_i32_0 : i32, i32
  }
  func.func @transform_2(%arg0: i32) -> (i32, i32) {
    %c0_i32 = arith.constant 0 : i32
    %c0_i32_0 = arith.constant 0 : i32
    %c0_i32_1 = arith.constant 0 : i32
    return %c0_i32, %c0_i32_0 : i32, i32
  }
  func.func @transform_3(%arg0: i32) -> (i32, i32) {
    %c0_i32 = arith.constant 0 : i32
    %c0_i32_0 = arith.constant 0 : i32
    %c0_i32_1 = arith.constant 0 : i32
    return %c0_i32, %c0_i32_0 : i32, i32
  }
  func.func @transform_4(%arg0: i32) -> (i32, i32) {
    %c0_i32 = arith.constant 0 : i32
    %c0_i32_0 = arith.constant 0 : i32
    return %arg0, %c0_i32 : i32, i32
  }
}

</mosaic_0001>

<bundles_post_ra>
// kernel: tpu_custom_call.1
= control target key start
LH: loop header
LB: loop body
LE: loop exit
PB: predicated region body
PF: predicated region fallthrough
CT: control target
= control target key end

     0   :  { %vm90_vm0 = vcmask 785408   ;;  %v816_v49 = vmov 0.0   ;;  %s1243_s0 = inlined_call_operand.vmem [shape: f32[2,8,96], index: 0, kind: input, shape index: {}]   ;;  %s1244_s1 = inlined_call_operand.vmem [shape: f32[96,512], index: 1, kind: input, shape index: {}]   ;;  %s1245_s2 = inlined_call_operand.vmem [shape: f32[1,512], index: 2, kind: input, shape index: {}]   ;;  %s1246_s3 = inlined_call_operand.vmem [shape: f32[512,4], index: 3, kind: input, shape index: {}]   ;;  %s1247_s4 = inlined_call_operand.hbm [shape: f32[2,384], index: 4, kind: output, shape index: {}]  }
   0x1   :  { %v65_v0 = vld [vmem:[%s1244_s1 + $0x168] sm:$0xff]  ;;  %v67_v1 = vld [vmem:[%s1244_s1 + $0x178] sm:$0xff]  ;;  %v64_v2 = vld [vmem:[%s1244_s1 + $0x160] sm:$0xff]  ;;  %161 = vmatprep.mubr.f32.mxu0 %v816_v49  ;;  %238 = vmatprep.mubr.f32.mxu1 %v816_v49 }
   0x2   :  { %105 = vmatprep.subr.mxu0 %v65_v0  ;;  %182 = vmatprep.subr.mxu1 %v67_v1  ;;  %v66_v3 = vld [vmem:[%s1244_s1 + $0x170] sm:$0xff]  ;;  %v61_v4 = vld [vmem:[%s1244_s1 + $0x148] sm:$0xff]  ;;  %v63_v5 = vld [vmem:[%s1244_s1 + $0x158] sm:$0xff] }
   0x3   :  { %106 = vmatpush1.msra.mxu0 %v64_v2  ;;  %183 = vmatpush1.msra.mxu1 %v66_v3  ;;  %v60_v6 = vld [vmem:[%s1244_s1 + $0x140] sm:$0xff]  ;;  %v62_v7 = vld [vmem:[%s1244_s1 + $0x150] sm:$0xff]  ;;  %v57_v8 = vld [vmem:[%s1244_s1 + $0x128] sm:$0xff] }
   0x4   :  { %107 = vmatprep.subr.mxu0 %v61_v4  ;;  %184 = vmatprep.subr.mxu1 %v63_v5  ;;  %v59_v9 = vld [vmem:[%s1244_s1 + $0x138] sm:$0xff]  ;;  %v56_v10 = vld [vmem:[%s1244_s1 + $0x120] sm:$0xff]  ;;  %v58_v11 = vld [vmem:[%s1244_s1 + $0x130] sm:$0xff] }
   0x5   :  { %108 = vmatpush1.msra.mxu0 %v60_v6  ;;  %185 = vmatpush1.msra.mxu1 %v62_v7  ;;  %v53_v12 = vld [vmem:[%s1244_s1 + $0x108] sm:$0xff]  ;;  %v55_v13 = vld [vmem:[%s1244_s1 + $0x118] sm:$0xff]  ;;  %v52_v14 = vld [vmem:[%s1244_s1 + $0x100] sm:$0xff] }
   0x6   :  { %109 = vmatprep.subr.mxu0 %v57_v8  ;;  %186 = vmatprep.subr.mxu1 %v59_v9  ;;  %v54_v15 = vld [vmem:[%s1244_s1 + $0x110] sm:$0xff]  ;;  %v49_v16 = vld [vmem:[%s1244_s1 + $0xe8] sm:$0xff]  ;;  %v51_v17 = vld [vmem:[%s1244_s1 + $0xf8] sm:$0xff] }
   0x7   :  { %110 = vmatpush1.msra.mxu0 %v56_v10  ;;  %187 = vmatpush1.msra.mxu1 %v58_v11  ;;  %v48_v18 = vld [vmem:[%s1244_s1 + $0xe0] sm:$0xff]  ;;  %v50_v19 = vld [vmem:[%s1244_s1 + $0xf0] sm:$0xff]  ;;  %v45_v20 = vld [vmem:[%s1244_s1 + $0xc8] sm:$0xff] }
   0x8   :  { %111 = vmatprep.subr.mxu0 %v53_v12  ;;  %188 = vmatprep.subr.mxu1 %v55_v13  ;;  %v47_v21 = vld [vmem:[%s1244_s1 + $0xd8] sm:$0xff]  ;;  %v44_v22 = vld [vmem:[%s1244_s1 + $0xc0] sm:$0xff]  ;;  %v46_v23 = vld [vmem:[%s1244_s1 + $0xd0] sm:$0xff] }
   0x9   :  { %112 = vmatpush1.msra.mxu0 %v52_v14  ;;  %189 = vmatpush1.msra.mxu1 %v54_v15  ;;  %v41_v24 = vld [vmem:[%s1244_s1 + $0xa8] sm:$0xff]  ;;  %v43_v25 = vld [vmem:[%s1244_s1 + $0xb8] sm:$0xff]  ;;  %v40_v26 = vld [vmem:[%s1244_s1 + $0xa0] sm:$0xff] }
   0xa   :  { %113 = vmatprep.subr.mxu0 %v49_v16  ;;  %190 = vmatprep.subr.mxu1 %v51_v17  ;;  %v42_v27 = vld [vmem:[%s1244_s1 + $0xb0] sm:$0xff]  ;;  %v37_v28 = vld [vmem:[%s1244_s1 + $0x88] sm:$0xff]  ;;  %v39_v29 = vld [vmem:[%s1244_s1 + $0x98] sm:$0xff] }
   0xb   :  { %114 = vmatpush1.msra.mxu0 %v48_v18  ;;  %191 = vmatpush1.msra.mxu1 %v50_v19  ;;  %v36_v30 = vld [vmem:[%s1244_s1 + $0x80] sm:$0xff]  ;;  %v38_v31 = vld [vmem:[%s1244_s1 + $0x90] sm:$0xff]  ;;  %v33_v32 = vld [vmem:[%s1244_s1 + $0x68] sm:$0xff] }
   0xc   :  { %115 = vmatprep.subr.mxu0 %v45_v20  ;;  %192 = vmatprep.subr.mxu1 %v47_v21  ;;  %v35_v33 = vld [vmem:[%s1244_s1 + $0x78] sm:$0xff]  ;;  %v32_v34 = vld [vmem:[%s1244_s1 + $0x60] sm:$0xff]  ;;  %v34_v35 = vld [vmem:[%s1244_s1 + $0x70] sm:$0xff] }
   0xd   :  { %116 = vmatpush1.msra.mxu0 %v44_v22  ;;  %193 = vmatpush1.msra.mxu1 %v46_v23  ;;  %v29_v36 = vld [vmem:[%s1244_s1 + $0x48] sm:$0xff]  ;;  %v31_v37 = vld [vmem:[%s1244_s1 + $0x58] sm:$0xff]  ;;  %v28_v38 = vld [vmem:[%s1244_s1 + $0x40] sm:$0xff] }
   0xe   :  { %117 = vmatprep.subr.mxu0 %v41_v24  ;;  %194 = vmatprep.subr.mxu1 %v43_v25  ;;  %v30_v39 = vld [vmem:[%s1244_s1 + $0x50] sm:$0xff]  ;;  %v25_v40 = vld [vmem:[%s1244_s1 + $0x28] sm:$0xff]  ;;  %v27_v41 = vld [vmem:[%s1244_s1 + $0x38] sm:$0xff] }
   0xf   :  { %118 = vmatpush1.msra.mxu0 %v40_v26  ;;  %195 = vmatpush1.msra.mxu1 %v42_v27  ;;  %v24_v42 = vld [vmem:[%s1244_s1 + $0x20] sm:$0xff]  ;;  %v26_v43 = vld [vmem:[%s1244_s1 + $0x30] sm:$0xff]  ;;  %v21_v44 = vld [vmem:[%s1244_s1 + $0x8] sm:$0xff] }
  0x10   :  { %119 = vmatprep.subr.mxu0 %v37_v28  ;;  %196 = vmatprep.subr.mxu1 %v39_v29  ;;  %v23_v45 = vld [vmem:[%s1244_s1 + $0x18] sm:$0xff]  ;;  %v20_v46 = vld [vmem:[%s1244_s1] sm:$0xff]  ;;  %v22_v47 = vld [vmem:[%s1244_s1 + $0x10] sm:$0xff] }
  0x11   :  { %120 = vmatpush1.msra.mxu0 %v36_v30  ;;  %197 = vmatpush1.msra.mxu1 %v38_v31  ;;  %v998_v48 = vld [vmem:[%s1243_s0] sm:$0xff]  ;;  %v290_v50 = vld [vmem:[%s1246_s3 + $0xf8] sm:$0xff] }
  0x12   :  { %121 = vmatprep.subr.mxu0 %v33_v32  ;;  %198 = vmatprep.subr.mxu1 %v35_v33  ;;  %v322_v51 = vld [vmem:[%s1246_s3 + $0x1f8] sm:$0xff] }
  0x13   :  { %122 = vmatpush1.msra.mxu0 %v32_v34  ;;  %199 = vmatpush1.msra.mxu1 %v34_v35 }
  0x14   :  { %123 = vmatprep.subr.mxu0 %v29_v36  ;;  %200 = vmatprep.subr.mxu1 %v31_v37 }
  0x15   :  { %124 = vmatpush1.msra.mxu0 %v28_v38  ;;  %201 = vmatpush1.msra.mxu1 %v30_v39 }
  0x16   :  { %125 = vmatprep.subr.mxu0 %v25_v40  ;;  %202 = vmatprep.subr.mxu1 %v27_v41 }
  0x17   :  { %126 = vmatpush1.msra.mxu0 %v24_v42  ;;  %203 = vmatpush1.msra.mxu1 %v26_v43 }
  0x18   :  { %127 = vmatprep.subr.mxu0 %v21_v44  ;;  %204 = vmatprep.subr.mxu1 %v23_v45 }
  0x19   :  { %128 = vmatpush1.msra.mxu0 %v20_v46  ;;  %205 = vmatpush1.msra.mxu1 %v22_v47 }
  0x1a   :  { %9 = vsyncpa [#allocation3], 0  ;;  %673 = vmatmul.mubr.msk.f32.vlgmr.msra.gmra.mxu0 %vm90_vm0, %v998_v48  ;;  %675 = vmatmul.mubr.msk.f32.vlgmr.msra.gmra.mxu1 %vm90_vm0, %v998_v48  ;;  %v274_v52 = vld [vmem:[%s1246_s3 + $0x78] sm:$0xff]  ;;  %v1019_v54 = vld [vmem:[%s1243_s0 + $0x8] sm:$0xff]  ;;  %vm473_vm1 = vcmask 31744   ;;  %vm612_vm2 = vcmask 1041409  }
  0x1b   :  { %v306_v53 = vld [vmem:[%s1246_s3 + $0x178] sm:$0xff]  ;;  %167 = vmatprep.mubr.f32.mxu0 %v816_v49  ;;  %244 = vmatprep.mubr.f32.mxu1 %v816_v49  ;;  %v289_v55 = vld [vmem:[%s1246_s3 + $0xf0] sm:$0xff]  ;;  %v288_v59 = vld [vmem:[%s1246_s3 + $0xe8] sm:$0xff]  ;;  %s823_s27 = smov 32   ;;  %vm634_vm3 = vcmask 523264   ;;  %vm636_vm4 = vcmask 261120  }
  0x1c   :  { %677 = vmatprep.subr.mxu0 %v290_v50  ;;  %715 = vmatprep.subr.mxu1 %v322_v51  ;;  %v321_v56 = vld [vmem:[%s1246_s3 + $0x1f0] sm:$0xff]  ;;  %v320_v60 = vld [vmem:[%s1246_s3 + $0x1e8] sm:$0xff]  ;;  %v287_v63 = vld [vmem:[%s1246_s3 + $0xe0] sm:$0xff]  ;;  %s825_s28 = smov [#allocation2]  }
  0x1d   :  { %678 = vmatpush3.msra.mxu0 %v274_v52  ;;  %716 = vmatpush3.msra.mxu1 %v306_v53  ;;  %v273_v57 = vld [vmem:[%s1246_s3 + $0x70] sm:$0xff]  ;;  %v272_v61 = vld [vmem:[%s1246_s3 + $0x68] sm:$0xff]  ;;  %v319_v0 = vld [vmem:[%s1246_s3 + $0x1e0] sm:$0xff]  ;;  %v70_v52 = vlaneseq  ;;  %s665_s29 = sshll.u32 %s825_s28, 4  ;;  %s666_s29 = int_to_ptr.vmem [resolvable:$true] %s665_s29 }
  0x1e   :  { %v305_v58 = vld [vmem:[%s1246_s3 + $0x170] sm:$0xff]  ;;  %674 = vmatmul.mubr.msk.f32.gmra.mxu0 %vm90_vm0, %v1019_v54  ;;  %676 = vmatmul.mubr.msk.f32.gmra.mxu1 %vm90_vm0, %v1019_v54  ;;  %v304_v62 = vld [vmem:[%s1246_s3 + $0x168] sm:$0xff]  ;;  %v271_v1 = vld [vmem:[%s1246_s3 + $0x60] sm:$0xff]  ;;  %s794_s30 = scalar_lea.vmem %s666_s29, 96  ;;  %p799_p1 = scmp.lt.s32.totalorder %s666_s29, %s666_s29 }
  0x1f   :  { %679 = vmatprep.subr.mxu0 %v289_v55  ;;  %717 = vmatprep.subr.mxu1 %v321_v56  ;;  %v303_v2 = vld [vmem:[%s1246_s3 + $0x160] sm:$0xff]  ;;  %v286_v3 = vld [vmem:[%s1246_s3 + $0xd8] sm:$0xff]  ;;  %v285_v7 = vld [vmem:[%s1246_s3 + $0xd0] sm:$0xff]  ;;  %v1205_v53 = vshrl.u32 %v70_v52, 7  ;;  %p795_p0 = scmp.ne.s32.totalorder %s666_s29, %s794_s30  ;;  %p800_p2 = scmp.lt.s32.totalorder %s794_s30, %s794_s30 }
  0x20   :  { %680 = vmatpush3.msra.mxu0 %v273_v57  ;;  %718 = vmatpush3.msra.mxu1 %v305_v58  ;;  %v318_v4 = vld [vmem:[%s1246_s3 + $0x1d8] sm:$0xff]  ;;  %v317_v8 = vld [vmem:[%s1246_s3 + $0x1d0] sm:$0xff]  ;;  %v284_v11 = vld [vmem:[%s1246_s3 + $0xc8] sm:$0xff] }
  0x21   :  { %681 = vmatprep.subr.mxu0 %v288_v59  ;;  %719 = vmatprep.subr.mxu1 %v320_v60  ;;  %v270_v5 = vld [vmem:[%s1246_s3 + $0x58] sm:$0xff]  ;;  %v269_v9 = vld [vmem:[%s1246_s3 + $0x50] sm:$0xff]  ;;  %v316_v12 = vld [vmem:[%s1246_s3 + $0x1c8] sm:$0xff]  ;;  %v72_v55 = vsub.s32 0, %v1205_v53  ;;  %v80_v57 = vsub.s32 2, %v1205_v53  ;;  %v76_v58 = vsub.s32 1, %v1205_v53  ;;  %p801_p3 = por %p800_p2, %p799_p1 }
  0x22   :  { %682 = vmatpush3.msra.mxu0 %v272_v61  ;;  %720 = vmatpush3.msra.mxu1 %v304_v62  ;;  %v302_v6 = vld [vmem:[%s1246_s3 + $0x158] sm:$0xff]  ;;  %v301_v10 = vld [vmem:[%s1246_s3 + $0x150] sm:$0xff]  ;;  %v268_v13 = vld [vmem:[%s1246_s3 + $0x48] sm:$0xff]  ;;  %v84_v59 = vsub.s32 3, %v1205_v53 }
  0x23   :  { %683 = vmatprep.subr.mxu0 %v287_v63  ;;  %721 = vmatprep.subr.mxu1 %v319_v0  ;;  %v300_v14 = vld [vmem:[%s1246_s3 + $0x148] sm:$0xff]  ;;  %v283_v15 = vld [vmem:[%s1246_s3 + $0xc0] sm:$0xff]  ;;  %v282_v19 = vld [vmem:[%s1246_s3 + $0xb8] sm:$0xff]  ;;  %p802_p4 = pnand %p801_p3, %p795_p0 }
  0x24   :  { %684 = vmatpush3.msra.mxu0 %v271_v1  ;;  %722 = vmatpush3.msra.mxu1 %v303_v2  ;;  %v315_v16 = vld [vmem:[%s1246_s3 + $0x1c0] sm:$0xff]  ;;  %v314_v20 = vld [vmem:[%s1246_s3 + $0x1b8] sm:$0xff]  ;;  %v281_v23 = vld [vmem:[%s1246_s3 + $0xb0] sm:$0xff] }
  0x25   :  { %685 = vmatprep.subr.mxu0 %v286_v3  ;;  %723 = vmatprep.subr.mxu1 %v318_v4  ;;  %v267_v17 = vld [vmem:[%s1246_s3 + $0x40] sm:$0xff]  ;;  %v266_v21 = vld [vmem:[%s1246_s3 + $0x38] sm:$0xff]  ;;  %v313_v24 = vld [vmem:[%s1246_s3 + $0x1b0] sm:$0xff] }
  0x26   :  { %686 = vmatpush3.msra.mxu0 %v270_v5  ;;  %724 = vmatpush3.msra.mxu1 %v302_v6  ;;  %v299_v18 = vld [vmem:[%s1246_s3 + $0x140] sm:$0xff]  ;;  %v298_v22 = vld [vmem:[%s1246_s3 + $0x138] sm:$0xff]  ;;  %v265_v25 = vld [vmem:[%s1246_s3 + $0x30] sm:$0xff] }
  0x27   :  { %687 = vmatprep.subr.mxu0 %v285_v7  ;;  %725 = vmatprep.subr.mxu1 %v317_v8  ;;  %v297_v26 = vld [vmem:[%s1246_s3 + $0x130] sm:$0xff]  ;;  %v280_v27 = vld [vmem:[%s1246_s3 + $0xa8] sm:$0xff]  ;;  %v279_v31 = vld [vmem:[%s1246_s3 + $0xa0] sm:$0xff] }
  0x28   :  { %688 = vmatpush3.msra.mxu0 %v269_v9  ;;  %726 = vmatpush3.msra.mxu1 %v301_v10  ;;  %v312_v28 = vld [vmem:[%s1246_s3 + $0x1a8] sm:$0xff]  ;;  %v311_v32 = vld [vmem:[%s1246_s3 + $0x1a0] sm:$0xff]  ;;  %v278_v35 = vld [vmem:[%s1246_s3 + $0x98] sm:$0xff] }
  0x29   :  { %689 = vmatprep.subr.mxu0 %v284_v11  ;;  %727 = vmatprep.subr.mxu1 %v316_v12  ;;  %v264_v29 = vld [vmem:[%s1246_s3 + $0x28] sm:$0xff]  ;;  %v263_v33 = vld [vmem:[%s1246_s3 + $0x20] sm:$0xff]  ;;  %v310_v36 = vld [vmem:[%s1246_s3 + $0x198] sm:$0xff] }
  0x2a   :  { %690 = vmatpush3.msra.mxu0 %v268_v13  ;;  %728 = vmatpush3.msra.mxu1 %v300_v14  ;;  %v296_v30 = vld [vmem:[%s1246_s3 + $0x128] sm:$0xff]  ;;  %v295_v34 = vld [vmem:[%s1246_s3 + $0x120] sm:$0xff]  ;;  %v262_v37 = vld [vmem:[%s1246_s3 + $0x18] sm:$0xff] }
  0x2b   :  { %691 = vmatprep.subr.mxu0 %v283_v15  ;;  %729 = vmatprep.subr.mxu1 %v315_v16  ;;  %v294_v38 = vld [vmem:[%s1246_s3 + $0x118] sm:$0xff]  ;;  %v277_v39 = vld [vmem:[%s1246_s3 + $0x90] sm:$0xff]  ;;  %v276_v43 = vld [vmem:[%s1246_s3 + $0x88] sm:$0xff] }
  0x2c   :  { %692 = vmatpush3.msra.mxu0 %v267_v17  ;;  %730 = vmatpush3.msra.mxu1 %v299_v18  ;;  %v309_v40 = vld [vmem:[%s1246_s3 + $0x190] sm:$0xff]  ;;  %v308_v44 = vld [vmem:[%s1246_s3 + $0x188] sm:$0xff]  ;;  %v275_v47 = vld [vmem:[%s1246_s3 + $0x80] sm:$0xff] }
  0x2d   :  { %693 = vmatprep.subr.mxu0 %v282_v19  ;;  %731 = vmatprep.subr.mxu1 %v314_v20  ;;  %v261_v41 = vld [vmem:[%s1246_s3 + $0x10] sm:$0xff]  ;;  %v260_v45 = vld [vmem:[%s1246_s3 + $0x8] sm:$0xff]  ;;  %v307_v49 = vld [vmem:[%s1246_s3 + $0x180] sm:$0xff] }
  0x2e   :  { %694 = vmatpush3.msra.mxu0 %v266_v21  ;;  %732 = vmatpush3.msra.mxu1 %v298_v22  ;;  %v293_v42 = vld [vmem:[%s1246_s3 + $0x110] sm:$0xff]  ;;  %v292_v46 = vld [vmem:[%s1246_s3 + $0x108] sm:$0xff]  ;;  %v259_v50 = vld [vmem:[%s1246_s3] sm:$0xff] }
  0x2f   :  { %695 = vmatprep.subr.mxu0 %v281_v23  ;;  %733 = vmatprep.subr.mxu1 %v313_v24  ;;  %v291_v51 = vld [vmem:[%s1246_s3 + $0x100] sm:$0xff]  ;;  %v817_v24 = vmov 2   ;;  %s822_s3 = smov 64  }
  0x30   :  { %696 = vmatpush3.msra.mxu0 %v265_v25  ;;  %734 = vmatpush3.msra.mxu1 %v297_v26  ;;  %v68_v56 = vld [vmem:[%s1245_s2] sm:$0xf]  ;;  %v818_v25 = vmov 1   ;;  %s821_s2 = smov 96  }
  0x31   :  { %697 = vmatprep.subr.mxu0 %v280_v27  ;;  %735 = vmatprep.subr.mxu1 %v312_v28  ;;  %v73_v60 = vrot.slane %v68_v56, %v72_v55  ;;  %v81_v61 = vrot.slane %v68_v56, %v80_v57  ;;  %v77_v62 = vrot.slane %v68_v56, %v76_v58 }
  0x32   :  { %698 = vmatpush3.msra.mxu0 %v264_v29  ;;  %736 = vmatpush3.msra.mxu1 %v296_v30  ;;  %v85_v63 = vrot.slane %v68_v56, %v84_v59 }
  0x33   :  { %699 = vmatprep.subr.mxu0 %v279_v31  ;;  %737 = vmatprep.subr.mxu1 %v311_v32 }
  0x34   :  { %700 = vmatpush3.msra.mxu0 %v263_v33  ;;  %738 = vmatpush3.msra.mxu1 %v295_v34 }
  0x35   :  { %701 = vmatprep.subr.mxu0 %v278_v35  ;;  %739 = vmatprep.subr.mxu1 %v310_v36 }
  0x36   :  { %702 = vmatpush3.msra.mxu0 %v262_v37  ;;  %740 = vmatpush3.msra.mxu1 %v294_v38 }
  0x37   :  { %703 = vmatprep.subr.mxu0 %v277_v39  ;;  %741 = vmatprep.subr.mxu1 %v309_v40 }
  0x38   :  { %704 = vmatpush3.msra.mxu0 %v261_v41  ;;  %742 = vmatpush3.msra.mxu1 %v293_v42 }
  0x39   :  { %705 = vmatprep.subr.mxu0 %v276_v43  ;;  %743 = vmatprep.subr.mxu1 %v308_v44 }
  0x3a   :  { %706 = vmatpush3.msra.mxu0 %v260_v45  ;;  %744 = vmatpush3.msra.mxu1 %v292_v46 }
  0x3b   :  { %707 = vmatprep.subr.mxu0 %v275_v47  ;;  %745 = vmatprep.subr.mxu1 %v307_v49 }
  0x3c   :  { %708 = vmatpush3.msra.mxu0 %v259_v50  ;;  %746 = vmatpush3.msra.mxu1 %v291_v51 }
  0x3d   :  { %764 = vset.pattern.permute.xlu1 %v817_v24  ;;  %763 = vset.pattern.permute.xlu0 %v818_v25 }
  0xda   :  { %v163_v0 = vpop.f32.mrf.mxu0  ;;  %v240_v1 = vpop.f32.mrf.mxu1 }
  0xdb   :  { %v164_v2 = vadd.f32 %v163_v0, %v73_v60  ;;  %v241_v5 = vadd.f32 %v240_v1, %v81_v61 }
  0xdc   :  { %v165_v3 = vpop.f32.mrf.mxu0  ;;  %v242_v4 = vpop.f32.mrf.mxu1 }
  0xdd   :  { %v166_v6 = vadd.f32 %v165_v3, %v77_v62  ;;  %v243_v7 = vadd.f32 %v242_v4, %v85_v63  ;;  %770 = vtanh.f32 %v164_v2 }
  0xde   :  { %v169_v8 = vpop.f32.mrf.mxu0  ;;  %v246_v9 = vpop.f32.mrf.mxu1 }
  0xdf   :  { %772 = vtanh.f32 %v166_v6  ;;  %v170_v10 = vadd.f32 %v169_v8, %v73_v60  ;;  %v247_v13 = vadd.f32 %v246_v9, %v81_v61 }
  0xe0   :  { %774 = vtanh.f32 %v243_v7  ;;  %v171_v11 = vpop.f32.mrf.mxu0  ;;  %v248_v12 = vpop.f32.mrf.mxu1 }
  0xe1   :  { %776 = vtanh.f32 %v241_v5  ;;  %v172_v14 = vadd.f32 %v171_v11, %v77_v62  ;;  %v249_v15 = vadd.f32 %v248_v12, %v85_v63 }
  0xe2   :  { %778 = vtanh.f32 %v170_v10 }
  0xe3   :  { %780 = vtanh.f32 %v172_v14 }
  0xe4   :  { %782 = vtanh.f32 %v249_v15 }
  0xe5   :  { %784 = vtanh.f32 %v247_v13 }
  0xea   :  { %v771_v16 = vpop.eup %770 }
  0xec   :  { %v773_v17 = vpop.eup %772 }
  0xed   :  { %v775_v18 = vpop.eup %774  ;;  %387 = vmatprep.mubr.f32.mxu0 %v773_v17  ;;  %v819_v17 = vmov 3  }
  0xee   :  { %v777_v19 = vpop.eup %776  ;;  %462 = vmatprep.mubr.f32.mxu1 %v775_v18  ;;  %388 = vmatmul.mubr.f32.vlgmr.msra.gmra.mxu0 %v771_v16  ;;  %v820_v18 = vmov 0  }
  0xef   :  { %v779_v20 = vpop.eup %778  ;;  %463 = vmatmul.mubr.f32.vlgmr.msra.gmra.mxu1 %v777_v19 }
  0xf0   :  { %v781_v21 = vpop.eup %780 }
  0xf1   :  { %v783_v22 = vpop.eup %782  ;;  %392 = vmatprep.mubr.f32.mxu0 %v781_v21 }
  0xf2   :  { %v785_v23 = vpop.eup %784  ;;  %467 = vmatprep.mubr.f32.mxu1 %v783_v22  ;;  %393 = vmatmul.mubr.f32.gmra.mxu0 %v779_v20 }
  0xf3   :  { %468 = vmatmul.mubr.f32.gmra.mxu1 %v785_v23 }
 0x1ae   :  { %v709_v26 = vpop.f32.mrf.mxu0 }
 0x1af   :  { %v747_v27 = vpop.f32.mrf.mxu1 }
 0x1b0   :  { %v710_v28 = vpop.f32.mrf.mxu0 }
 0x1b1   :  { %v711_v29 = vadd.f32 %v710_v28, %v709_v26  ;;  %v748_v30 = vpop.f32.mrf.mxu1 }
 0x1b2   :  { %v749_v31 = vadd.f32 %v748_v30, %v747_v27  ;;  %v712_v32 = vpop.f32.mrf.mxu0 }
 0x1b3   :  { %v750_v33 = vpop.f32.mrf.mxu1 }
 0x1b4   :  { %v465_v34 = vadd.f32 %v749_v31, %v711_v29  ;;  %v713_v35 = vpop.f32.mrf.mxu0 }
 0x1b5   :  { %v714_v36 = vadd.f32 %v713_v35, %v712_v32  ;;  %v751_v37 = vpop.f32.mrf.mxu1 }
 0x1b6   :  { %v474_v38 = vsel %vm473_vm1, %v465_v34, -inf  ;;  %v752_v39 = vadd.f32 %v751_v37, %v750_v33 }
 0x1b7   :  { %v475_v40 = vrot.slane %v474_v38, 4 }
 0x1b8   :  { %v470_v41 = vadd.f32 %v752_v39, %v714_v36 }
 0x1b9   :  { %v476_v42 = vmax.f32 %v474_v38, %v475_v40 }
 0x1ba   :  { %v481_v43 = vsel %vm473_vm1, %v470_v41, -inf }
 0x1bb   :  { %v477_v44 = vrot.slane %v476_v42, 2  ;;  %v482_v45 = vrot.slane %v481_v43, 4 }
 0x1bd   :  { %v478_v46 = vmax.f32 %v476_v42, %v477_v44  ;;  %v483_v47 = vmax.f32 %v481_v43, %v482_v45 }
 0x1bf   :  { %v479_v49 = vrot.slane %v478_v46, 1  ;;  %v484_v50 = vrot.slane %v483_v47, 2 }
 0x1c1   :  { %v480_v51 = vmax.f32 %v478_v46, %v479_v49  ;;  %v485_v52 = vmax.f32 %v483_v47, %v484_v50 }
 0x1c3   :  { %v488_v55 = vsub.f32 %v465_v34, %v480_v51  ;;  %v486_v56 = vrot.slane %v485_v52, 1 }
 0x1c5   :  { %v490_v57 = vmul.f32 1.442695, %v488_v55  ;;  %v487_v58 = vmax.f32 %v485_v52, %v486_v56 }
 0x1c7   :  { %786 = vpow2.f32 %v490_v57  ;;  %v489_v59 = vsub.f32 %v470_v41, %v487_v58 }
 0x1c9   :  { %v492_v60 = vmul.f32 1.442695, %v489_v59 }
 0x1cb   :  { %788 = vpow2.f32 %v492_v60 }
 0x1d4   :  { %v787_v61 = vpop.eup %786 }
 0x1d5   :  { %v494_v62 = vsel %vm473_vm1, %v787_v61, 0.0 }
 0x1d6   :  { %v495_v63 = vrot.slane %v494_v62, 4 }
 0x1d8   :  { %v789_v0 = vpop.eup %788  ;;  %v496_v1 = vadd.f32 %v495_v63, %v494_v62 }
 0x1d9   :  { %v501_v2 = vsel %vm473_vm1, %v789_v0, 0.0 }
 0x1da   :  { %v497_v3 = vrot.slane %v496_v1, 2  ;;  %v502_v4 = vrot.slane %v501_v2, 4 }
 0x1dc   :  { %v498_v5 = vadd.f32 %v497_v3, %v496_v1  ;;  %v503_v6 = vadd.f32 %v502_v4, %v501_v2 }
 0x1de   :  { %v499_v7 = vrot.slane %v498_v5, 1  ;;  %v504_v8 = vrot.slane %v503_v6, 2 }
 0x1e0   :  { %v500_v9 = vadd.f32 %v499_v7, %v498_v5  ;;  %v505_v10 = vadd.f32 %v504_v8, %v503_v6 }
 0x1e2   :  { %790 = vrcp.f32 %v500_v9  ;;  %v506_v11 = vrot.slane %v505_v10, 1 }
 0x1e4   :  { %v507_v12 = vadd.f32 %v506_v11, %v505_v10 }
 0x1e6   :  { %792 = vrcp.f32 %v507_v12 }
 0x1ef   :  { %v791_v13 = vpop.eup %790 }
 0x1f0   :  { %v510_v14 = vmul.f32 %v791_v13, %v787_v61 }
 0x1f2   :  { %563 = vperm.xlu1 %764, %v510_v14   ;;  %539 = vperm.xlu0 %763, %v510_v14  }
 0x1f3   :  { %v793_v15 = vpop.eup %792 }
 0x1f4   :  { %v511_v16 = vmul.f32 %v793_v15, %v789_v0 }
 0x1f6   :  { %567 = vperm.xlu1 %764, %v511_v16   ;;  %543 = vperm.xlu0 %763, %v511_v16  }
 0x1fa   :  { %766 = vset.pattern.permute.xlu1 %v819_v17  ;;  %765 = vset.pattern.permute.xlu0 %v819_v17 }
 0x1fb   :  { %591 = vperm.xlu1 %766, %v511_v16   ;;  %587 = vperm.xlu0 %765, %v510_v14  }
 0x1ff   :  { %767 = vset.pattern.permute.xlu1 %v820_v18  ;;  %768 = vset.pattern.permute.xlu0 %v820_v18 }
 0x200   :  { %514 = vperm.xlu1 %767, %v510_v14   ;;  %519 = vperm.xlu0 %768, %v511_v16  }
 0x204   :  { %769 = vset.pattern.permute.xlu0 %v819_v17 }
 0x26d   :  { %v564_v19 = vpop.permute.xlu1 %563  ;;  %v540_v20 = vpop.permute.xlu0 %539 }
 0x26e   :  { %v570_v21 = vmul.f32 %v564_v19, %v998_v48  ;;  %v546_v22 = vmul.f32 %v540_v20, %v998_v48 }
 0x270   :  { %v572_v23 = vsel %vm90_vm0, %v570_v21, 0.0  ;;  %v548_v24 = vsel %vm90_vm0, %v546_v22, 0.0 }
 0x271   :  { %v573_v25 = vrot.slane %v572_v23, 4  ;;  %v549_v26 = vrot.slane %v548_v24, 4  ;;  %v568_v27 = vpop.permute.xlu1 %567  ;;  %v544_v28 = vpop.permute.xlu0 %543 }
 0x272   :  { %v571_v29 = vmul.f32 %v568_v27, %v1019_v54  ;;  %v547_v30 = vmul.f32 %v544_v28, %v1019_v54 }
 0x273   :  { %v550_v31 = vadd.f32 %v549_v26, %v548_v24  ;;  %v574_v32 = vadd.f32 %v573_v25, %v572_v23 }
 0x274   :  { %v579_v33 = vsel %vm90_vm0, %v571_v29, 0.0  ;;  %v555_v34 = vsel %vm90_vm0, %v547_v30, 0.0  ;;  %v824_v29 = vmov 1983009808  }
 0x275   :  { %v551_v35 = vrot.slane %v550_v31, 2  ;;  %v580_v36 = vrot.slane %v579_v33, 4  ;;  %v556_v37 = vrot.slane %v555_v34, 4  ;;  %v575_v42 = vrot.slane %v574_v32, 2 }
 0x276   :  { %v592_v38 = vpop.permute.xlu1 %591  ;;  %v588_v39 = vpop.permute.xlu0 %587  ;;  %v643_v30 = vunpack.c.l.s4 %v824_v29 }
 0x277   :  { %v581_v40 = vadd.f32 %v580_v36, %v579_v33  ;;  %v557_v41 = vadd.f32 %v556_v37, %v555_v34  ;;  %v552_v43 = vadd.f32 %v551_v35, %v550_v31  ;;  %v595_v44 = vmul.f32 %v592_v38, %v1019_v54 }
 0x278   :  { %v594_v45 = vmul.f32 %v588_v39, %v998_v48  ;;  %v576_v57 = vadd.f32 %v575_v42, %v574_v32  ;;  %v644_v33 = vunpack.c.0.s8 %v643_v30 }
 0x279   :  { %v582_v46 = vrot.slane %v581_v40, 2  ;;  %v558_v47 = vrot.slane %v557_v41, 2  ;;  %v603_v49 = vsel %vm90_vm0, %v595_v44, 0.0  ;;  %v553_v58 = vrot.slane %v552_v43, 1 }
 0x27a   :  { %v596_v50 = vsel %vm90_vm0, %v594_v45, 0.0  ;;  %v604_v55 = vrot.slane %v603_v49, 4  ;;  %v577_v1 = vrot.slane %v576_v57, 1  ;;  %v647_v35 = vsub.s32 %v644_v33, %v1205_v53 }
 0x27b   :  { %v583_v51 = vadd.f32 %v582_v46, %v581_v40  ;;  %v559_v52 = vadd.f32 %v558_v47, %v557_v41  ;;  %v597_v56 = vrot.slane %v596_v50, 4  ;;  %v554_v2 = vadd.f32 %v553_v58, %v552_v43  ;;  %v515_v15 = vpop.permute.xlu1 %514  ;;  %v520_v16 = vpop.permute.xlu0 %519 }
 0x27c   :  { %v605_v60 = vadd.f32 %v604_v55, %v603_v49  ;;  %v578_v10 = vadd.f32 %v577_v1, %v576_v57  ;;  %v522_v17 = vmul.f32 %v515_v15, %v998_v48  ;;  %v523_v18 = vmul.f32 %v520_v16, %v1019_v54 }
 0x27d   :  { %v560_v59 = vrot.slane %v559_v52, 1  ;;  %v598_v61 = vadd.f32 %v597_v56, %v596_v50  ;;  %v584_v62 = vrot.slane %v583_v51, 1 }
 0x27e   :  { %v606_v63 = vrot.slane %v605_v60, 2  ;;  %v524_v19 = vsel %vm90_vm0, %v522_v17, 0.0  ;;  %v531_v20 = vsel %vm90_vm0, %v523_v18, 0.0 }
 0x27f   :  { %v599_v0 = vrot.slane %v598_v61, 2  ;;  %v561_v3 = vadd.f32 %v560_v59, %v559_v52  ;;  %v585_v7 = vadd.f32 %v584_v62, %v583_v51  ;;  %v525_v21 = vrot.slane %v524_v19, 4 }
 0x280   :  { %v607_v4 = vadd.f32 %v606_v63, %v605_v60  ;;  %v532_v22 = vrot.slane %v531_v20, 4 }
 0x281   :  { %v600_v5 = vadd.f32 %v599_v0, %v598_v61  ;;  %v617_v6 = vsel %vm612_vm2, %v561_v3, %v554_v2  ;;  %v623_v13 = vsel %vm612_vm2, %v585_v7, %v578_v10  ;;  %v526_v23 = vadd.f32 %v525_v21, %v524_v19 }
 0x282   :  { %v608_v8 = vrot.slane %v607_v4, 1  ;;  %618 = vrot.lane.b32.xlu1 %v617_v6, %s821_s2  ;;  %v533_v24 = vadd.f32 %v532_v22, %v531_v20 }
 0x283   :  { %v601_v9 = vrot.slane %v600_v5, 1  ;;  %v527_v25 = vrot.slane %v526_v23, 2 }
 0x284   :  { %v609_v12 = vadd.f32 %v608_v8, %v607_v4  ;;  %v534_v26 = vrot.slane %v533_v24, 2 }
 0x285   :  { %v602_v11 = vadd.f32 %v601_v9, %v600_v5  ;;  %v528_v27 = vadd.f32 %v527_v25, %v526_v23 }
 0x286   :  { %624 = vrot.lane.b32.xlu1 %v623_v13, %s822_s3  ;;  %v535_v28 = vadd.f32 %v534_v26, %v533_v24 }
 0x287   :  { %v629_v14 = vsel %vm612_vm2, %v609_v12, %v602_v11  ;;  %v529_v31 = vrot.slane %v528_v27, 1 }
 0x288   :  { %630 = vrot.lane.b32.xlu0 %v629_v14, %s823_s27  ;;  %v536_v32 = vrot.slane %v535_v28, 1 }
 0x289   :  { %v530_v48 = vadd.f32 %v529_v31, %v528_v27 }
 0x28a   :  { %v537_v34 = vadd.f32 %v536_v32, %v535_v28 }
 0x28c   :  { %v613_v36 = vsel %vm612_vm2, %v537_v34, %v530_v48 }
 0x2f4   :  { %v619_v54 = vpop.permute.xlu1 %618 }
 0x2f5   :  { %v633_v38 = vsel %vm90_vm0, %v613_v36, %v619_v54 }
 0x2f8   :  { %v625_v37 = vpop.permute.xlu1 %624 }
 0x2f9   :  { %v635_v39 = vsel %vm634_vm3, %v619_v54, %v625_v37 }
 0x2fa   :  { %v631_v40 = vpop.permute.xlu0 %630  ;;  %v641_v41 = vcombine.low %v633_v38, %v635_v39 }
 0x2fb   :  { %v637_v42 = vsel %vm636_vm4, %v625_v37, %v631_v40 }
 0x2fc   :  { %v655_v43 = vrot.slane %v637_v42, %v647_v35  ;;  %v648_v44 = vrot.slane %v641_v41, %v647_v35 }
 0x2fe   :  { %v656_v45 = vcombine.low %v648_v44, %v655_v43 }
 0x300   :  { %658 = vst [vmem:[#allocation2] sm:$0x3f] %v656_v45 }
 0x301   :  { %805 = shalt.err (!%p802_p4)
}
 0x302   :  { %668 = dma.vmem_to_hbm [thread:$0]  %s666_s29, 96, %s1247_s4, [#allocation3]  }
 0x303   :  { %814 = dma.done.wait [#allocation3], 96  }
 0x304   :  { %815 = vsyncadd [#allocation3], 4294967200 }
 0x305   :  { %672 = vsyncpa [#allocation3], 1 }

</bundles_post_ra>
